<compile_context>
chip_gen: v6e
topology: v6e:2x2x1
jax: 0.10.0
libtpu: 0.0.40
codegen_flags: <defaults>
</compile_context>

<pallas_src>
import functools
import math

import jax
import jax.numpy as jnp
from jax.experimental import pallas as pl
from jax.experimental.pallas import tpu as pltpu

_NUM_CORES = 2    # split the reduction across 2 TensorCores (harmless on 1-TC chips)
_ROW_ALIGN = 32   # row-tile multiple; covers f32 (8) and bf16 (16) sublane packing


def _label_smoothing_kernel(logits_ref, targets_ref, mask_ref, sum_ref, *,
                            smooth_val, confidence, row_const):
    """One (row_tile, V) slab: log_softmax + algebraic label-smoothed KL row sum."""
    i = pl.program_id(1)

    @pl.when(i == 0)
    def _():
        sum_ref[...] = jnp.zeros_like(sum_ref)

    x = logits_ref[...].astype(jnp.float32)           # (TM, V) -- f32 math on-chip
    t = targets_ref[...]                              # (TM, 1) int32
    t = jnp.where(t < 0, 0, t)                        # assign_seq[assign_seq < 0] = 0
    m = mask_ref[...]                                 # (TM, 1) f32 0/1

    # log_softmax over the vocab axis.
    xmax = jnp.max(x, axis=-1, keepdims=True)
    lse = jnp.log(jnp.sum(jnp.exp(x - xmax), axis=-1, keepdims=True)) + xmax
    logP = x - lse                                    # (TM, V)

    # Algebraic KL:
    #   KL(row) = sum_j td_j * (log td_j - logP_j)
    #           = row_const - smooth_val * sum_j logP_j
    #                       - (confidence - smooth_val) * logP[target]
    idx = jax.lax.broadcasted_iota(jnp.int32, x.shape, 1)
    logP_t = jnp.sum(jnp.where(idx == t, logP, 0.0), axis=-1, keepdims=True)
    logP_sum = jnp.sum(logP, axis=-1, keepdims=True)
    loss_row = (row_const
                - smooth_val * logP_sum
                - (confidence - smooth_val) * logP_t)  # (TM, 1)

    # Masked accumulation into this core's resident output block (scalar broadcast add).
    sum_ref[...] += jnp.sum(loss_row * m)


def _pick_row_tile(n_rows_per_core, vocab, itemsize):
    """Largest aligned row tile whose working set fits the scoped-VMEM budget."""
    try:
        vmem_cap = int(pltpu.get_tpu_info().vmem_capacity_bytes)
    except Exception:  # unknown chip / interpret mode
        vmem_cap = 64 * 1024 * 1024
    # Budget: double-buffered native-dtype logits block + ~2 f32 working copies.
    budget = min(vmem_cap // 2, 40 * 1024 * 1024)
    per_row = vocab * (2 * itemsize + 2 * 4)
    rt = budget // max(per_row, 1)
    rt = max(_ROW_ALIGN, min(512, (rt // _ROW_ALIGN) * _ROW_ALIGN))
    # No point tiling wider than the (aligned) per-core work.
    rows_aligned = ((n_rows_per_core + _ROW_ALIGN - 1) // _ROW_ALIGN) * _ROW_ALIGN
    rt = min(rt, max(rows_aligned, _ROW_ALIGN))
    return rt, vmem_cap


def label_smoothing_loss(logits, targets, *, eos_id, label_smoothing, loss_weight):
    """Replicates LabelSmoothing.forward for the G_LOGITS branch.

    logits:  (B, T, V) float (f32 or bf16 -- fed to the kernel in native dtype)
    targets: (B, T) int      (token ids; also used as `seq` for the EOS mask)
    """
    B, T, V = logits.shape
    N = B * T

    # mask = cumsum(seq == eos_id) == 0, shifted right with a leading 1 column.
    is_eos = (targets == eos_id)
    mask = jnp.cumsum(is_eos.astype(jnp.int32), axis=-1) == 0
    mask = jnp.concatenate(
        [jnp.ones((B, 1), dtype=mask.dtype), mask[:, :-1]], axis=1)

    logits2 = logits.reshape(N, V)                     # native dtype: no HBM f32 copy
    targets2 = targets.reshape(N, 1).astype(jnp.int32)
    mask2 = mask.reshape(N, 1).astype(jnp.float32)
    loss_cnt = jnp.sum(mask2)                          # count done in the wrapper

    itemsize = jnp.dtype(logits.dtype).itemsize
    per_core_rows = -(-N // _NUM_CORES)
    row_tile, vmem_cap = _pick_row_tile(per_core_rows, V, itemsize)
    tiles_per_core = -(-N // (_NUM_CORES * row_tile))
    n_pad = _NUM_CORES * row_tile * tiles_per_core

    if n_pad != N:                                     # padded rows carry mask == 0
        pad = n_pad - N
        logits2 = jnp.pad(logits2, ((0, pad), (0, 0)))
        targets2 = jnp.pad(targets2, ((0, pad), (0, 0)))
        mask2 = jnp.pad(mask2, ((0, pad), (0, 0)))

    # Static per-call constants (guard against log(0) when smoothing is 0 or 1).
    ls = float(label_smoothing)
    confidence = 1.0 - ls
    smooth_val = ls / (V - 1) if V > 1 else 0.0
    row_const = 0.0
    if confidence > 0.0:
        row_const += confidence * math.log(confidence)
    if smooth_val > 0.0:
        row_const += (V - 1) * smooth_val * math.log(smooth_val)

    kernel = functools.partial(
        _label_smoothing_kernel,
        smooth_val=smooth_val, confidence=confidence, row_const=row_const)

    logits_tile_bytes = row_tile * V * itemsize
    work_bytes = row_tile * V * 4
    vmem_limit = int(min(vmem_cap - (8 << 20),
                         max(32 << 20,
                             2 * logits_tile_bytes + 2 * work_bytes + (4 << 20))))

    row_map = lambda c, i: (c * tiles_per_core + i, 0)
    partials = pl.pallas_call(
        kernel,
        out_shape=jax.ShapeDtypeStruct((_NUM_CORES, 8, 128), jnp.float32),
        grid_spec=pltpu.PrefetchScalarGridSpec(
            num_scalar_prefetch=0,
            grid=(_NUM_CORES, tiles_per_core),
            in_specs=[
                pl.BlockSpec((row_tile, V), row_map),
                pl.BlockSpec((row_tile, 1), row_map),
                pl.BlockSpec((row_tile, 1), row_map),
            ],
            out_specs=pl.BlockSpec((1, 8, 128), lambda c, i: (c, 0, 0)),
        ),
        compiler_params=pltpu.CompilerParams(
            dimension_semantics=("parallel", "arbitrary"),
            vmem_limit_bytes=vmem_limit),
    )(logits2, targets2, mask2)

    loss_sum = jnp.sum(partials[:, 0, 0])              # one scalar partial per core
    loss = loss_sum / loss_cnt                         # masked_select(...).mean()
    return loss * loss_weight


def _reference_loss(logits, targets, *, eos_id, label_smoothing, loss_weight):
    """Pure-JAX reference of the PyTorch semantics (for sanity checking)."""
    B, T, V = logits.shape
    is_eos = (targets == eos_id)
    mask = jnp.cumsum(is_eos.astype(jnp.int32), axis=-1) == 0
    mask = jnp.concatenate([jnp.ones((B, 1), dtype=mask.dtype), mask[:, :-1]], 1)
    logP = jax.nn.log_softmax(logits.reshape(-1, V).astype(jnp.float32), axis=-1)
    t = jnp.clip(targets.reshape(-1), 0, None)
    smooth_val = label_smoothing / (V - 1)
    confidence = 1.0 - label_smoothing
    onehot = jax.nn.one_hot(t, V, dtype=bool)
    td = jnp.where(onehot, confidence, smooth_val)
    loss_row = jnp.sum(td * (jnp.log(td) - logP), axis=-1)
    m = mask.reshape(-1).astype(jnp.float32)
    loss = jnp.sum(loss_row * m) / jnp.sum(m)
    return loss * loss_weight


if __name__ == "__main__":
    # Small shapes consistent with the module: B=2 sequences, T=8 steps, V=32 vocab.
    B, T, V = 2, 8, 32
    eos_id = 3
    label_smoothing = 0.1
    loss_weight = 1.0

    key = jax.random.PRNGKey(0)
    k_logits, k_targets = jax.random.split(key)
    logits = jax.random.normal(k_logits, (B, T, V), dtype=jnp.float32)
    targets = jax.random.randint(k_targets, (B, T), 0, V, dtype=jnp.int32)

    loss = label_smoothing_loss(
        logits, targets,
        eos_id=eos_id, label_smoothing=label_smoothing, loss_weight=loss_weight)
    loss = jax.block_until_ready(loss)

    ref = _reference_loss(
        logits, targets,
        eos_id=eos_id, label_smoothing=label_smoothing, loss_weight=loss_weight)
    assert jnp.allclose(loss, ref, rtol=1e-4, atol=1e-4), (loss, ref)

    print("KERNEL_OK")
</pallas_src>

<mosaic_0001>
module attributes {stable_mosaic.version = 11 : i64} {
  func.func @_label_smoothing_kernel(%arg0: i32, %arg1: i32, %arg2: memref<32x32xf32, #tpu.memory_space<vmem>>, %arg3: memref<32x1xi32, #tpu.memory_space<vmem>>, %arg4: memref<32x1xf32, #tpu.memory_space<vmem>>, %arg5: memref<1x8x128xf32, #tpu.memory_space<vmem>>) attributes {dimension_semantics = [#tpu.dimension_semantics<parallel>, #tpu.dimension_semantics<arbitrary>], iteration_bounds = array<i64: 2, 1>, scalar_prefetch = 0 : i64, scratch_operands = 0 : i64, tpu.core_type = #tpu.core_type<tc>, window_params = [{transform_indices = @transform_0, window_bounds = array<i64: 32, 32>}, {transform_indices = @transform_1, window_bounds = array<i64: 32, 1>}, {transform_indices = @transform_2, window_bounds = array<i64: 32, 1>}, {transform_indices = @transform_3, window_bounds = array<i64: 1, 8, 128>}]} {
    %c0_i32 = arith.constant 0 : i32
    %0 = arith.cmpi eq, %arg1, %c0_i32 : i32
    %1 = arith.extui %0 : i1 to i32
    %c0_i32_0 = arith.constant 0 : i32
    %2 = arith.cmpi ne, %1, %c0_i32_0 : i32
    scf.if %2 {
      %cst_22 = arith.constant 0.000000e+00 : f32
      %46 = vector.broadcast %cst_22 : f32 to vector<1x8x128xf32>
      %c0_23 = arith.constant 0 : index
      %c0_24 = arith.constant 0 : index
      %c0_25 = arith.constant 0 : index
      %47 = vector.load %arg5[%c0_23, %c0_24, %c0_25] : memref<1x8x128xf32, #tpu.memory_space<vmem>>, vector<1x8x128xf32>
      tpu.vector_store %arg5[%c0_23, %c0_24, %c0_25], %46 {strides = array<i32>} : memref<1x8x128xf32, #tpu.memory_space<vmem>>, vector<1x8x128xf32>,
    } else {
    }
    %c0 = arith.constant 0 : index
    %c0_1 = arith.constant 0 : index
    %3 = vector.load %arg2[%c0, %c0_1] : memref<32x32xf32, #tpu.memory_space<vmem>>, vector<32x32xf32>
    %c0_2 = arith.constant 0 : index
    %c0_3 = arith.constant 0 : index
    %4 = vector.load %arg3[%c0_2, %c0_3] : memref<32x1xi32, #tpu.memory_space<vmem>>, vector<32x1xi32>
    %c0_i32_4 = arith.constant 0 : i32
    %5 = vector.broadcast %c0_i32_4 : i32 to vector<32x1xi32>
    %6 = arith.cmpi slt, %4, %5 : vector<32x1xi32>
    %c0_i32_5 = arith.constant 0 : i32
    %7 = vector.broadcast %c0_i32_5 : i32 to vector<32x1xi32>
    %8 = arith.select %6, %7, %4 : vector<32x1xi1>, vector<32x1xi32>
    %c0_6 = arith.constant 0 : index
    %c0_7 = arith.constant 0 : index
    %9 = vector.load %arg4[%c0_6, %c0_7] : memref<32x1xf32, #tpu.memory_space<vmem>>, vector<32x1xf32>
    %cst = arith.constant dense<0xFF800000> : vector<32xf32>
    %10 = vector.multi_reduction <maximumf>, %3, %cst [1] : vector<32x32xf32> to vector<32xf32>
    %11 = vector.shape_cast %10 : vector<32xf32> to vector<32x1xf32>
    %12 = vector.broadcast %11 : vector<32x1xf32> to vector<32x32xf32>
    %13 = arith.subf %3, %12 : vector<32x32xf32>
    %14 = math.exp %13 : vector<32x32xf32>
    %cst_8 = arith.constant dense<0.000000e+00> : vector<32xf32>
    %15 = vector.multi_reduction <add>, %14, %cst_8 [1] : vector<32x32xf32> to vector<32xf32>
    %16 = vector.shape_cast %15 : vector<32xf32> to vector<32x1xf32>
    %17 = math.log %16 : vector<32x1xf32>
    %18 = arith.addf %17, %11 : vector<32x1xf32>
    %19 = vector.broadcast %18 : vector<32x1xf32> to vector<32x32xf32>
    %20 = arith.subf %3, %19 : vector<32x32xf32>
    %21 = tpu.iota {dimensions = array<i32: 1>} : vector<32x32xi32>
    %22 = vector.broadcast %8 : vector<32x1xi32> to vector<32x32xi32>
    %23 = arith.cmpi eq, %21, %22 : vector<32x32xi32>
    %cst_9 = arith.constant 0.000000e+00 : f32
    %24 = vector.broadcast %cst_9 : f32 to vector<32x32xf32>
    %25 = arith.select %23, %20, %24 : vector<32x32xi1>, vector<32x32xf32>
    %cst_10 = arith.constant dense<0.000000e+00> : vector<32xf32>
    %26 = vector.multi_reduction <add>, %25, %cst_10 [1] : vector<32x32xf32> to vector<32xf32>
    %27 = vector.shape_cast %26 : vector<32xf32> to vector<32x1xf32>
    %cst_11 = arith.constant dense<0.000000e+00> : vector<32xf32>
    %28 = vector.multi_reduction <add>, %20, %cst_11 [1] : vector<32x32xf32> to vector<32xf32>
    %29 = vector.shape_cast %28 : vector<32xf32> to vector<32x1xf32>
    %cst_12 = arith.constant 0.0032258064 : f32
    %30 = vector.broadcast %cst_12 : f32 to vector<32x1xf32>
    %31 = arith.mulf %30, %29 : vector<32x1xf32>
    %cst_13 = arith.constant -0.668481708 : f32
    %32 = vector.broadcast %cst_13 : f32 to vector<32x1xf32>
    %33 = arith.subf %32, %31 : vector<32x1xf32>
    %cst_14 = arith.constant 0.896774172 : f32
    %34 = vector.broadcast %cst_14 : f32 to vector<32x1xf32>
    %35 = arith.mulf %34, %27 : vector<32x1xf32>
    %36 = arith.subf %33, %35 : vector<32x1xf32>
    %c0_15 = arith.constant 0 : index
    %c0_16 = arith.constant 0 : index
    %c0_17 = arith.constant 0 : index
    %37 = vector.load %arg5[%c0_15, %c0_16, %c0_17] : memref<1x8x128xf32, #tpu.memory_space<vmem>>, vector<1x8x128xf32>
    %38 = arith.mulf %36, %9 : vector<32x1xf32>
    %39 = vector.shape_cast %38 : vector<32x1xf32> to vector<1x32x1xf32>
    %cst_18 = arith.constant dense<0.000000e+00> : vector<1xf32>
    %40 = vector.multi_reduction <add>, %39, %cst_18 [1, 2] : vector<1x32x1xf32> to vector<1xf32>
    %41 = vector.shape_cast %40 : vector<1xf32> to vector<1x1x1xf32>
    %42 = vector.extract %41[0, 0, 0] : f32 from vector<1x1x1xf32>
    %43 = vector.broadcast %42 : f32 to vector<1x8x128xf32>
    %44 = arith.addf %37, %43 : vector<1x8x128xf32>
    %c0_19 = arith.constant 0 : index
    %c0_20 = arith.constant 0 : index
    %c0_21 = arith.constant 0 : index
    %45 = vector.load %arg5[%c0_19, %c0_20, %c0_21] : memref<1x8x128xf32, #tpu.memory_space<vmem>>, vector<1x8x128xf32>
    tpu.vector_store %arg5[%c0_19, %c0_20, %c0_21], %44 {strides = array<i32>} : memref<1x8x128xf32, #tpu.memory_space<vmem>>, vector<1x8x128xf32>,
    return
  }
  func.func @transform_0(%arg0: i32, %arg1: i32) -> (i32, i32) {
    %c1_i32 = arith.constant 1 : i32
    %0 = arith.muli %arg0, %c1_i32 : i32
    %1 = arith.addi %0, %arg1 : i32
    %c0_i32 = arith.constant 0 : i32
    %c0_i32_0 = arith.constant 0 : i32
    return %1, %c0_i32 : i32, i32
  }
  func.func @transform_1(%arg0: i32, %arg1: i32) -> (i32, i32) {
    %c1_i32 = arith.constant 1 : i32
    %0 = arith.muli %arg0, %c1_i32 : i32
    %1 = arith.addi %0, %arg1 : i32
    %c0_i32 = arith.constant 0 : i32
    %c0_i32_0 = arith.constant 0 : i32
    return %1, %c0_i32 : i32, i32
  }
  func.func @transform_2(%arg0: i32, %arg1: i32) -> (i32, i32) {
    %c1_i32 = arith.constant 1 : i32
    %0 = arith.muli %arg0, %c1_i32 : i32
    %1 = arith.addi %0, %arg1 : i32
    %c0_i32 = arith.constant 0 : i32
    %c0_i32_0 = arith.constant 0 : i32
    return %1, %c0_i32 : i32, i32
  }
  func.func @transform_3(%arg0: i32, %arg1: i32) -> (i32, i32, i32) {
    %c0_i32 = arith.constant 0 : i32
    %c0_i32_0 = arith.constant 0 : i32
    %c0_i32_1 = arith.constant 0 : i32
    return %arg0, %c0_i32, %c0_i32_0 : i32, i32, i32
  }
}

</mosaic_0001>

<bundles_post_ra>
// kernel: tpu_custom_call.1
= control target key start
LH: loop header
LB: loop body
LE: loop exit
PB: predicated region body
PF: predicated region fallthrough
CT: control target
= control target key end

     0   :  { %8 = vsyncpa [#allocation3], 0  ;;  %s860_s0 = inlined_call_operand.vmem [shape: f32[64,32], index: 0, kind: input, shape index: {}]   ;;  %s861_s1 = inlined_call_operand.vmem [shape: s32[64,1], index: 1, kind: input, shape index: {}]   ;;  %s862_s2 = inlined_call_operand.vmem [shape: f32[64,1], index: 2, kind: input, shape index: {}]   ;;  %s863_s3 = inlined_call_operand.hbm [shape: f32[2,8,128], index: 3, kind: output, shape index: {}]  }
   0x1   :  { %10 = vsyncpa [#allocation3 + $0x1], 0  ;;  %s711_s12 = smov 0   ;;  %s713_s13 = smov 0  }
   0x2   :  { %s715_s14 = smov 0   ;;  %s717_s15 = smov 0  }
   0x3   :  { %s719_s16 = smov 0   ;;  %s721_s17 = smov 0  }
   0x4 LB: > { %s518_s18 = sadd.s32 4294967295, %s687_s17   ;;  %s519_s19 = sadd.s32 4294967294, %s687_s17   ;;  %s687_s17 = sphi %s721_s17, %s16_s17   ;;  %s683_s16 = sphi %s719_s16, %s870_s16   ;;  %s679_s15 = sphi %s717_s15, %s869_s15   ;;  %s675_s14 = sphi %s715_s14, %s868_s14   ;;  %s671_s13 = sphi %s713_s13, %s867_s13   ;;  %s667_s12 = sphi %s711_s12, %s866_s12  }
   0x5   : > { %s28_s20 = sadd.s32 1, %s683_s16  ;;  %s119_s21 = sadd.s32 1, %s675_s14 }
   0x6   : > { %p30_p0 = scmp.ge.s32.totalorder %s28_s20, 2  ;;  %p129_p1 = scmp.ne.s32.totalorder %s675_s14, %s671_s13 }
   0x7   : > { %p130_p2 = scmp.eq.s32.totalorder %s518_s18, 1  ;;  %p135_p3 = scmp.ne.s32.totalorder %s671_s13, %s667_s12 }
   0x8   : > { %s872_s20 = smov (%p30_p0, %s28_s20), 0  ;;  %p136_p5 = scmp.eq.s32.totalorder %s519_s19, 1 }
   0x9   : > { %p751_p4 = por %p130_p2, %p129_p1  ;;  %s116_s23 = ssub.s32 %s683_s16, %s872_s20 }
   0xa   : > { %p522_p6 = scmp.ge.s32.totalorder %s687_s17, 1  ;;  %p117_p7 = scmp.eq.s32.totalorder %s116_s23, 0 }
   0xb   : > { %p758_p8 = por %p136_p5, %p135_p3  ;;  %p187_p9 = scmp.lt.s32.totalorder %s687_s17, 3 }
   0xc   : > { %s764_s25 = scalar_select %p117_p7, %s675_s14, %s119_s21  }
   0xd   : > { %p188_p10 = pnand %p522_p6, %p187_p9 }
   0xe   : > { %s524_s26 = sshll.u32 (!%p188_p10), %s679_s15, 2  ;;  %s221_s10 = sand.u32 (!%p188_p10), 1, %s671_s13  }
   0xf   : > { %191 = sbr.rel (%p188_p10) target bundleno = 765 (0x2fd), region = 32  ;;  %p226_p11 = scmp.lt.s32.totalorder (!%p188_p10), %s524_s26, 7 }
  0x10   : > { %s523_s11 = sshll.u32 (!%p188_p10), %s221_s10, 3  ;;  %s531_s18 = sshll.u32 (!%p188_p10), %s679_s15, 7 }
  0x11   : > { %s223_s19 = scalar_lea.vmem (!%p188_p10), [#allocation2], %s523_s11  ;;  %s425_s28 = scalar_lea.hbm (!%p188_p10), %s863_s3, %s531_s18 }
  0x12   : > { %s427_s21 = sshll.u32 (!%p188_p10), %s223_s19, 4  ;;  %s414_s29 = scalar_lea.sflag (!%p188_p10), [#allocation3], %s221_s10  ;;  %s428_s21 = int_to_ptr.vmem [resolvable:$true] %s427_s21 }
  0x13   : > { %s690_s4 = smov (!%p188_p10), [#allocation2]  }
  0x14   : > { %s874_s26 = smov (!%p226_p11, %s524_s26), 7  ;;  %vm273_vm0 = vcmask 261120   ;;  %v689_v8 = vmov 0   ;;  %v326_v44 = vlaneseq  ;;  %vm393_vm9 = vcmask 7168   ;;  %s615_s5 = sshll.u32 %s690_s4, 4  ;;  %s616_s5 = int_to_ptr.vmem [resolvable:$false] %s615_s5 }
  0x15   : > { %s767_s27 = sshll.u32 %s874_s26, 3  ;;  %594 = vset.pattern.permute.xlu1 %v689_v8  ;;  %593 = vset.pattern.permute.xlu0 %v689_v8  ;;  %s617_s15 = scalar_lea.vmem %s616_s5, 256 }
  0x16   : > { %s229_s30 = scalar_lea.vmem %s860_s0, %s767_s27  ;;  %s237_s6 = scalar_lea.vmem %s861_s1, %s767_s27  ;;  %v327_v52 = vand.u32 127, %v326_v44 }
  0x17   : > { %v773_v0 = vld [vmem:[%s229_s30] sm:$0xff]  ;;  %v775_v1 = vld [vmem:[%s229_s30 + $0x10] sm:$0xff]  ;;  %v777_v2 = vld [vmem:[%s229_s30 + $0x8] sm:$0xff]  ;;  %s245_s9 = scalar_lea.vmem %s862_s2, %s767_s27  ;;  %p618_p1 = scmp.lt.s32.totalorder %s428_s21, %s616_s5 }
  0x18   : > { %v274_v3 = vsel %vm273_vm0, %v773_v0, -inf  ;;  %v280_v4 = vsel %vm273_vm0, %v775_v1, -inf  ;;  %v783_v5 = vld [vmem:[%s229_s30 + $0x18] sm:$0xff]  ;;  %v277_v6 = vsel %vm273_vm0, %v777_v2, -inf  ;;  %v258_v24 = vld [vmem:[%s237_s6 + $0x8] sm:$0xff]  ;;  %v259_v25 = vld [vmem:[%s237_s6 + $0x10] sm:$0xff] }
  0x19   : > { %275 = vmax.xlane.f32.xlu0 %v274_v3  ;;  %281 = vmax.xlane.f32.xlu1 %v280_v4  ;;  %v283_v7 = vsel %vm273_vm0, %v783_v5, -inf  ;;  %vm262_vm1 = vcmp.lt.s32.totalorder %v258_v24, 0  ;;  %v257_v26 = vld [vmem:[%s237_s6] sm:$0xff]  ;;  %vm263_vm2 = vcmp.lt.s32.totalorder %v259_v25, 0  ;;  %v260_v35 = vld [vmem:[%s237_s6 + $0x18] sm:$0xff]  ;;  %s611_s30 = scalar_lea.vmem %s428_s21, 128 }
  0x1a   : > { %v266_v27 = vsel %vm262_vm1, 0, %v258_v24  ;;  %vm261_vm3 = vcmp.lt.s32.totalorder %v257_v26, 0  ;;  %v267_v28 = vsel %vm263_vm2, 0, %v259_v25  ;;  %vm264_vm4 = vcmp.lt.s32.totalorder %v260_v35, 0  ;;  %p612_p12 = scmp.ne.s32.totalorder %s428_s21, %s611_s30  ;;  %p619_p2 = scmp.lt.s32.totalorder %s617_s15, %s611_s30 }
  0x1b   : > { %v265_v29 = vsel %vm261_vm3, 0, %v257_v26  ;;  %v268_v36 = vsel %vm264_vm4, 0, %v260_v35 }
  0x1c   : > { %p613_p13 = pnand %p612_p12, %p751_p4  ;;  %p620_p3 = por %p619_p2, %p618_p1 }
  0x1d   : > { %278 = vmax.xlane.f32.xlu0 %v277_v6  ;;  %284 = vmax.xlane.f32.xlu1 %v283_v7 }
  0x1e   : > { %p614_p0 = pneg %p613_p13 }
  0x20   : > { %p621_p5 = pnand %p620_p3, %p614_p0 }
  0xa2   : > { %v276_v9 = vpop.xlane.xlu0 %275  ;;  %v789_v10 = vpop.xlane.xlu1 %281 }
  0xa3   : > { %v286_v11 = vsub.f32 %v773_v0, %v276_v9  ;;  %v288_v12 = vsub.f32 %v775_v1, %v789_v10 }
  0xa5   : > { %v290_v13 = vmul.f32 1.442695, %v286_v11  ;;  %v294_v14 = vmul.f32 1.442695, %v288_v12 }
  0xa6   : > { %v279_v15 = vpop.xlane.xlu0 %278  ;;  %v285_v30 = vpop.xlane.xlu1 %284 }
  0xa7   : > { %595 = vpow2.f32 %v290_v13  ;;  %v287_v16 = vsub.f32 %v777_v2, %v279_v15  ;;  %v289_v31 = vsub.f32 %v783_v5, %v285_v30 }
  0xa8   : > { %597 = vpow2.f32 %v294_v14 }
  0xa9   : > { %v292_v17 = vmul.f32 1.442695, %v287_v16  ;;  %v296_v32 = vmul.f32 1.442695, %v289_v31  ;;  %v271_v31 = vld [vmem:[%s245_s9 + $0x10] sm:$0xff] }
  0xab   : > { %599 = vpow2.f32 %v292_v17 }
  0xac   : > { %601 = vpow2.f32 %v296_v32 }
  0xb4   : > { %v596_v18 = vpop.eup %595 }
  0xb5   : > { %v598_v19 = vpop.eup %597  ;;  %v298_v20 = vsel %vm273_vm0, %v596_v18, 0.0 }
  0xb6   : > { %299 = vadd.xlane.f32.xlu0 %v298_v20  ;;  %v304_v21 = vsel %vm273_vm0, %v598_v19, 0.0 }
  0xb8   : > { %v600_v22 = vpop.eup %599 }
  0xb9   : > { %v301_v23 = vsel %vm273_vm0, %v600_v22, 0.0  ;;  %v602_v33 = vpop.eup %601 }
  0xba   : > { %305 = vadd.xlane.f32.xlu0 %v304_v21  ;;  %302 = vadd.xlane.f32.xlu1 %v301_v23  ;;  %v307_v34 = vsel %vm273_vm0, %v602_v33, 0.0 }
  0xcb   : > { %332 = vperm.xlu1 %594, %v266_v27   ;;  %v270_v27 = vld [vmem:[%s245_s9 + $0x8] sm:$0xff] }
  0xcf   : > { %335 = vperm.xlu1 %594, %v267_v28  }
  0xd0   : > { %329 = vperm.xlu0 %593, %v265_v29  }
  0xf3   : > { %308 = vadd.xlane.f32.xlu1 %v307_v34 }
 0x104   : > { %338 = vperm.xlu1 %594, %v268_v36  }
 0x13f   : > { %v300_v37 = vpop.xlane.xlu0 %299 }
 0x140   : > { %603 = vlog2.f32 %v300_v37 }
 0x143   : > { %v303_v38 = vpop.xlane.xlu1 %302  ;;  %v306_v39 = vpop.xlane.xlu0 %305 }
 0x144   : > { %605 = vlog2.f32 %v303_v38 }
 0x145   : > { %607 = vlog2.f32 %v306_v39 }
 0x147   : > { %v333_v56 = vpop.permute.xlu1 %332 }
 0x148   : > { %vm341_vm6 = vcmp.eq.s32.totalorder %v327_v52, %v333_v56 }
 0x14b   : > { %v330_v49 = vpop.permute.xlu0 %329  ;;  %v336_v61 = vpop.permute.xlu1 %335 }
 0x14c   : > { %vm340_vm5 = vcmp.eq.s32.totalorder %v327_v52, %v330_v49  ;;  %vm342_vm7 = vcmp.eq.s32.totalorder %v327_v52, %v336_v61 }
 0x14d   : > { %v604_v40 = vpop.eup %603 }
 0x14e   : > { %v311_v41 = vmul.f32 0.6931472, %v604_v40 }
 0x150   : > { %v318_v42 = vadd.f32 %v311_v41, %v276_v9  ;;  %v272_v41 = vld [vmem:[%s245_s9 + $0x18] sm:$0xff] }
 0x151   : > { %v606_v43 = vpop.eup %605 }
 0x152   : > { %v608_v45 = vpop.eup %607  ;;  %v313_v46 = vmul.f32 0.6931472, %v606_v43  ;;  %v322_v47 = vsub.f32 %v773_v0, %v318_v42 }
 0x153   : > { %v315_v48 = vmul.f32 0.6931472, %v608_v45 }
 0x154   : > { %v360_v50 = vsel %vm273_vm0, %v322_v47, 0.0  ;;  %v319_v51 = vadd.f32 %v313_v46, %v279_v15  ;;  %v344_v59 = vsel %vm340_vm5, %v322_v47, 0.0 }
 0x155   : > { %361 = vadd.xlane.f32.xlu1 %v360_v50  ;;  %v320_v53 = vadd.f32 %v315_v48, %v789_v10  ;;  %v348_v60 = vsel %vm273_vm0, %v344_v59, 0.0 }
 0x156   : > { %v323_v54 = vsub.f32 %v777_v2, %v319_v51 }
 0x157   : > { %v324_v55 = vsub.f32 %v775_v1, %v320_v53 }
 0x158   : > { %v363_v57 = vsel %vm273_vm0, %v323_v54, 0.0  ;;  %v345_v62 = vsel %vm341_vm6, %v323_v54, 0.0 }
 0x159   : > { %364 = vadd.xlane.f32.xlu0 %v363_v57  ;;  %v366_v58 = vsel %vm273_vm0, %v324_v55, 0.0  ;;  %v351_v63 = vsel %vm273_vm0, %v345_v62, 0.0  ;;  %v346_v0 = vsel %vm342_vm7, %v324_v55, 0.0 }
 0x15a   : > { %367 = vadd.xlane.f32.xlu1 %v366_v58  ;;  %v354_v1 = vsel %vm273_vm0, %v346_v0, 0.0 }
 0x15e   : > { %349 = vadd.xlane.f32.xlu1 %v348_v60 }
 0x162   : > { %352 = vadd.xlane.f32.xlu1 %v351_v63 }
 0x166   : > { %355 = vadd.xlane.f32.xlu1 %v354_v1 }
 0x17c   : > { %v309_v2 = vpop.xlane.xlu1 %308 }
 0x17d   : > { %609 = vlog2.f32 %v309_v2 }
 0x180   : > { %v339_v6 = vpop.permute.xlu1 %338 }
 0x181   : > { %vm343_vm8 = vcmp.eq.s32.totalorder %v327_v52, %v339_v6 }
 0x18a   : > { %v610_v3 = vpop.eup %609 }
 0x18b   : > { %v317_v4 = vmul.f32 0.6931472, %v610_v3 }
 0x18d   : > { %v321_v7 = vadd.f32 %v317_v4, %v285_v30  ;;  %v269_v30 = vld [vmem:[%s245_s9] sm:$0xff] }
 0x18f   : > { %v325_v8 = vsub.f32 %v783_v5, %v321_v7 }
 0x191   : > { %v369_v9 = vsel %vm273_vm0, %v325_v8, 0.0  ;;  %v347_v10 = vsel %vm343_vm8, %v325_v8, 0.0 }
 0x192   : > { %370 = vadd.xlane.f32.xlu0 %v369_v9  ;;  %v357_v11 = vsel %vm273_vm0, %v347_v10, 0.0 }
 0x193   : > { %358 = vadd.xlane.f32.xlu1 %v357_v11 }
 0x1de   : > { %v362_v12 = vpop.xlane.xlu1 %361 }
 0x1df   : > { %v372_v19 = vmul.f32 0.0032258064, %v362_v12 }
 0x1e1   : > { %v376_v24 = vsub.f32 -0.6684817, %v372_v19 }
 0x1e2   : > { %v365_v16 = vpop.xlane.xlu0 %364 }
 0x1e3   : > { %v368_v13 = vpop.xlane.xlu1 %367  ;;  %v373_v17 = vmul.f32 0.0032258064, %v365_v16 }
 0x1e4   : > { %v374_v20 = vmul.f32 0.0032258064, %v368_v13 }
 0x1e5   : > { %v377_v5 = vsub.f32 -0.6684817, %v373_v17 }
 0x1e6   : > { %v378_v25 = vsub.f32 -0.6684817, %v374_v20 }
 0x1e7   : > { %v350_v14 = vpop.xlane.xlu1 %349 }
 0x1e8   : > { %v380_v22 = vmul.f32 0.8967742, %v350_v14 }
 0x1ea   : > { %v384_v28 = vsub.f32 %v376_v24, %v380_v22 }
 0x1eb   : > { %v353_v15 = vpop.xlane.xlu1 %352 }
 0x1ec   : > { %v381_v21 = vmul.f32 0.8967742, %v353_v15  ;;  %v389_v34 = vmul.f32 %v384_v28, %v269_v30 }
 0x1ee   : > { %v385_v26 = vsub.f32 %v377_v5, %v381_v21  ;;  %v394_v43 = vsel %vm393_vm9, %v389_v34, 0.0 }
 0x1ef   : > { %v356_v18 = vpop.xlane.xlu1 %355 }
 0x1f0   : > { %v382_v23 = vmul.f32 0.8967742, %v356_v18  ;;  %v390_v32 = vmul.f32 %v385_v26, %v270_v27 }
 0x1f2   : > { %v386_v29 = vsub.f32 %v378_v25, %v382_v23  ;;  %v395_v40 = vsel %vm393_vm9, %v390_v32, 0.0 }
 0x1f3   : > { %v396_v45 = vadd.f32 %v395_v40, %v394_v43 }
 0x1f4   : > { %v391_v35 = vmul.f32 %v386_v29, %v271_v31 }
 0x1f6   : > { %v397_v44 = vsel %vm393_vm9, %v391_v35, 0.0 }
 0x1f7   : > { %v398_v47 = vadd.f32 %v397_v44, %v396_v45 }
 0x21b   : > { %v371_v33 = vpop.xlane.xlu0 %370 }
 0x21c   : > { %v375_v36 = vmul.f32 0.0032258064, %v371_v33  ;;  %v359_v37 = vpop.xlane.xlu1 %358 }
 0x21d   : > { %v383_v38 = vmul.f32 0.8967742, %v359_v37 }
 0x21e   : > { %v379_v39 = vsub.f32 -0.6684817, %v375_v36 }
 0x220   : > { %v387_v42 = vsub.f32 %v379_v39, %v383_v38 }
 0x222   : > { %v392_v46 = vmul.f32 %v387_v42, %v272_v41 }
 0x224   : > { %v399_v48 = vsel %vm393_vm9, %v392_v46, 0.0 }
 0x225   : > { %v400_v49 = vadd.f32 %v399_v48, %v398_v47 }
 0x227   : > { %401 = vadd.xlane.f32.xlu0 %v400_v49 }
 0x2b0   : > { %v402_v50 = vpop.xlane.xlu0 %401 }
 0x2b1   : > { %v403_v51 = vrot.slane %v402_v50, 4 }
 0x2b3   : > { %v404_v52 = vadd.f32 %v403_v51, %v402_v50 }
 0x2b5   : > { %v405_v53 = vrot.slane %v404_v52, 2 }
 0x2b7   : > { %v406_v54 = vadd.f32 %v405_v53, %v404_v52 }
 0x2b9   : > { %v407_v55 = vrot.slane %v406_v54, 1 }
 0x2bb   : > { %v408_v56 = vadd.f32 %v407_v55, %v406_v54 }
 0x2bd   : > { %534 = vpush %v408_v56 }
 0x2ee   : > { %s535_s23 = spop %534 }
 0x2ef   : > { %v410_v57 = vstv %s535_s23 }
 0x2f0   : > { %412 = vst [vmem:[%s223_s19] sm:$0xff] %v410_v57 }
 0x2f1   : > { %624 = shalt.err (!%p621_p5)
}
 0x2f2   : > { %s625_s6 = scalar_lea.hbm %s425_s28, 128  ;;  %s629_s9 = scalar_lea.hbm %s863_s3, 256 }
 0x2f3   : > { %p626_p6 = scmp.ne.s32.totalorder %s425_s28, %s625_s6  ;;  %p630_p10 = scmp.lt.s32.totalorder %s425_s28, %s863_s3 }
 0x2f4   : > { %p631_p11 = scmp.lt.s32.totalorder %s629_s9, %s625_s6 }
 0x2f5   : > { %p627_p7 = pnand %p626_p6, %p751_p4 }
 0x2f6   : > { %p632_p12 = por %p631_p11, %p630_p10 }
 0x2f7   : > { %p628_p9 = pneg %p627_p7 }
 0x2f9   : > { %p633_p13 = pnand %p632_p12, %p628_p9 }
 0x2fb   : > { %636 = shalt.err (!%p633_p13)
}
 0x2fc   : > { %536 = dma.vmem_to_hbm [thread:$0]  (%p751_p4), %s428_s21, 128, %s425_s28, %s414_s29  }
 0x2fd PF: > { %p542_p0 = scmp.ge.s32.totalorder %s687_s17, 2  ;;  %s439_s18 = sand.u32 1, %s667_s12  }
 0x2fe   : > { %s440_s19 = scalar_lea.sflag [#allocation3], %s439_s18 }
 0x2ff   : > { %p539_p1 = pnand %p542_p0, %p758_p8 }
 0x301   : > { %p540_p2 = pneg %p539_p1 }
 0x303   : > { %662 = dma.done.wait (%p540_p2), %s440_s19, 128  }
 0x304   : > { %664 = vsyncadd (%p540_p2), %s440_s19, 4294967168  ;;  %s16_s17 = sadd.s32 1, %s687_s17   ;;  %s866_s12 = smov %s671_s13 }
 0x305   : > { %p13_p3 = scmp.ge.s32.totalorder %s16_s17, 4   ;;  %s867_s13 = smov %s675_s14 }
 0x306   : > { %s868_s14 = smov %s764_s25  ;;  %s869_s15 = smov %s683_s16 }
 0x307   : > { %s870_s16 = smov %s872_s20  ;;  %15 = sbr.rel (!%p13_p3) target bundleno = 4 (0x4), region = 77 }
 0x30c   :  { %445 = vsyncpa [#allocation3], 1 }
 0x30d   :  { %447 = vsyncpa [#allocation3 + $0x1], 1 }

</bundles_post_ra>
